<compile_context>
chip_gen: v7x
topology: tpu7x:2x2x1
jax: 0.10.0
libtpu: 0.0.40
codegen_flags: <defaults>
</compile_context>

<pallas_src>
import functools

import jax
import jax.numpy as jnp
from jax import lax
from jax.experimental import pallas as pl
from jax.experimental.pallas import tpu as pltpu


# ----------------------------------------------------------------------------
# Kernel
# ----------------------------------------------------------------------------
def _resblock_kernel(x_ref, w1_ref, b1_ref, w2_ref, b2_ref, o_ref, *, H, res_scale):
    # x_ref : (TM, WC) f32 lane-dense rows; TM is a whole number of images (TM % H == 0)
    # w*_ref: (3*WC, WC) bf16 block-banded conv weights (dy-major row blocks)
    # b*_ref: (1, WC)    f32 bias tiled over W
    # o_ref : (TM, WC)   f32
    x = x_ref[...]                                   # (TM, WC) f32
    TM, WC = x.shape

    row = lax.broadcasted_iota(jnp.int32, (TM, WC), 0)
    first_row = (row % H) == 0                       # row h-1 does not exist -> zero pad
    last_row = (row % H) == (H - 1)                  # row h+1 does not exist -> zero pad

    def conv3x3(a_f32, w_ref, b_ref):
        zero = jnp.zeros_like(a_f32)
        # Shifted copies built with XLU rolls + selects; masks use row % H so
        # rows never leak between images stacked inside this tile.
        up = jnp.where(first_row, zero, pltpu.roll(a_f32, shift=1, axis=0))       # a[h-1]
        dn = jnp.where(last_row, zero, pltpu.roll(a_f32, shift=TM - 1, axis=0))   # a[h+1]
        # dy in {-1, 0, +1}: three accumulating MXU matmuls against static
        # (WC, WC) row slices of the banded weight (no concatenated slab).
        acc = jnp.dot(up.astype(jnp.bfloat16), w_ref[pl.ds(0, WC), :],
                      preferred_element_type=jnp.float32)
        acc += jnp.dot(a_f32.astype(jnp.bfloat16), w_ref[pl.ds(WC, WC), :],
                       preferred_element_type=jnp.float32)
        acc += jnp.dot(dn.astype(jnp.bfloat16), w_ref[pl.ds(2 * WC, WC), :],
                       preferred_element_type=jnp.float32)
        return acc + b_ref[...]                      # f32 bias add (broadcast over rows)

    y1 = jnp.maximum(conv3x3(x, w1_ref, b1_ref), 0.0)    # conv1 + ReLU (f32)
    y2 = conv3x3(y1, w2_ref, b2_ref)                     # conv2 (f32)

    # Residual: identity + out * res_scale, identity stays f32 the whole way.
    o_ref[...] = (x + y2 * jnp.float32(res_scale)).astype(o_ref.dtype)


# ----------------------------------------------------------------------------
# Host-side helpers (run once per network, not per call)
# ----------------------------------------------------------------------------
def _build_banded_weight(w, W):
    """OIHW (Cout, Cin, 3, 3) -> block-banded (3*W*Cin, W*Cout).

    big[dy*W*Cin + w_in*Cin + cin, w_out*Cout + cout]
        = w[cout, cin, dy, w_in - w_out + 1]   if 0 <= w_in - w_out + 1 < 3 else 0
    so conv(x, padding=1)[h] flattened over (w_out, cout) equals
    [x[h-1] | x[h] | x[h+1]] @ big (with zero rows at the image border).
    """
    Cout, Cin, KH, KW = w.shape
    wt = jnp.transpose(w, (2, 3, 1, 0)).astype(jnp.float32)    # (dy, dx, Cin, Cout)
    win = jnp.arange(W)[:, None]
    wout = jnp.arange(W)[None, :]
    dx = win - wout + 1                                        # (W, W)
    valid = (dx >= 0) & (dx < KW)
    dxc = jnp.clip(dx, 0, KW - 1)
    big = wt[:, dxc, :, :]                                     # (3, W, W, Cin, Cout)
    big = jnp.where(valid[None, :, :, None, None], big, 0.0)
    big = jnp.transpose(big, (0, 1, 3, 2, 4))                  # (3, W_in, Cin, W_out, Cout)
    return big.reshape(KH * W * Cin, W * Cout)


def prepare_resblock_params(w1, b1, w2, b2, *, W):
    """Hoisted weight prep: band + bf16-cast conv weights, tile biases over W."""
    w1b = _build_banded_weight(w1, W).astype(jnp.bfloat16)
    w2b = _build_banded_weight(w2, W).astype(jnp.bfloat16)
    WC = w1b.shape[1]
    b1r = jnp.tile(b1.astype(jnp.float32), W).reshape(1, WC)
    b2r = jnp.tile(b2.astype(jnp.float32), W).reshape(1, WC)
    return w1b, b1r, w2b, b2r


def pack_nchw(x_nchw):
    """NCHW -> lane-dense (N*H, W*C). Keep this layout end-to-end in a network."""
    N, C, H, W = x_nchw.shape
    return jnp.transpose(x_nchw, (0, 2, 3, 1)).reshape(N * H, W * C).astype(jnp.float32)


def unpack_nchw(x_packed, N, C, H, W):
    return jnp.transpose(x_packed.reshape(N, H, W, C), (0, 3, 1, 2))


def _choose_rows_per_step(n_images, H, target_rows=256):
    """Rows per grid step: whole images, ~target_rows tall (fills MXU M dim),
    sublane-aligned, and leaving >= 2 grid steps whenever there are >= 2 images
    (both v7x TensorCores get work and DMA pipelines with compute)."""
    best = 1
    for ips in range(1, n_images + 1):
        if n_images % ips:
            continue
        tm = ips * H
        steps = n_images // ips
        sublane_ok = (tm % 8 == 0) or (steps == 1)       # full-extent block is exempt
        if not sublane_ok:
            continue
        if tm <= target_rows and (steps >= 2 or n_images == 1):
            best = max(best, ips)
    if (best * H) % 8 != 0 and best != n_images:
        best = n_images                                  # single full-extent block
    return best * H


# ----------------------------------------------------------------------------
# Pallas call (lane-dense fast path)
# ----------------------------------------------------------------------------
def residual_block_no_bn_packed(x_packed, w1b, b1r, w2b, b2r, *, H, res_scale=1.0):
    """x_packed: (N*H, W*C) f32 lane-dense activations; weights pre-banded bf16."""
    M, WC = x_packed.shape
    assert M % H == 0, "packed rows must be a whole number of images"
    K = w1b.shape[0]                                     # 3 * W * C
    TM = _choose_rows_per_step(M // H, H)
    grid = (M // TM,)

    kernel = functools.partial(_resblock_kernel, H=H, res_scale=float(res_scale))
    cost = pl.CostEstimate(
        flops=2 * 2 * M * K * WC,                        # two convs, 2*M*K*N each
        transcendentals=0,
        bytes_accessed=2 * 4 * M * WC + 2 * 2 * K * WC + 2 * 4 * WC,
    )

    return pl.pallas_call(
        kernel,
        out_shape=jax.ShapeDtypeStruct((M, WC), jnp.float32),
        grid_spec=pltpu.PrefetchScalarGridSpec(
            num_scalar_prefetch=0,
            grid=grid,
            in_specs=[
                pl.BlockSpec((TM, WC), lambda m: (m, 0)),   # activations (tiled over M)
                pl.BlockSpec((K, WC), lambda m: (0, 0)),    # w1 (resident)
                pl.BlockSpec((1, WC), lambda m: (0, 0)),    # b1
                pl.BlockSpec((K, WC), lambda m: (0, 0)),    # w2
                pl.BlockSpec((1, WC), lambda m: (0, 0)),    # b2
            ],
            out_specs=pl.BlockSpec((TM, WC), lambda m: (m, 0)),
        ),
        compiler_params=pltpu.CompilerParams(
            dimension_semantics=("parallel",)),             # M tiles are independent
        cost_estimate=cost,
    )(x_packed, w1b, b1r, w2b, b2r)


def residual_block_no_bn(x_nchw, w1, b1, w2, b2, *, res_scale=1.0):
    """PyTorch-compatible convenience entry (NCHW in / NCHW out). For real use,
    hoist prepare_resblock_params / pack_nchw out of the per-block path."""
    N, C, H, W = x_nchw.shape
    assert (W * C) % 128 == 0, "lane-dense fast path requires W*C % 128 == 0"
    params = prepare_resblock_params(w1, b1, w2, b2, W=W)
    out_packed = residual_block_no_bn_packed(
        pack_nchw(x_nchw), *params, H=H, res_scale=res_scale)
    return unpack_nchw(out_packed, N, C, H, W)


# ----------------------------------------------------------------------------
# Reference + test
# ----------------------------------------------------------------------------
def _reference(x, w1, b1, w2, b2, res_scale):
    """Pure-JAX f32 reference using lax.conv (NCHW / OIHW), mirrors the PyTorch module."""
    dn = lax.conv_dimension_numbers(x.shape, w1.shape, ("NCHW", "OIHW", "NCHW"))
    y = lax.conv_general_dilated(x, w1, (1, 1), ((1, 1), (1, 1)), dimension_numbers=dn)
    y = jnp.maximum(y + b1[None, :, None, None], 0.0)
    y = lax.conv_general_dilated(y, w2, (1, 1), ((1, 1), (1, 1)), dimension_numbers=dn)
    y = y + b2[None, :, None, None]
    return x + y * res_scale


if __name__ == "__main__":
    # Small deterministic setup consistent with ResidualBlockNoBN(num_feat=C).
    # W * C = 128 -> one full lane tile; N = 4 so the M fold stacks 2 images per
    # grid step (TM = 32 rows) while still leaving 2 grid steps.
    N, C, H, W = 4, 8, 16, 16
    res_scale = 1.0

    key = jax.random.PRNGKey(0)
    kx, kw1, kw2 = jax.random.split(key, 3)

    x = jax.random.normal(kx, (N, C, H, W), jnp.float32)

    # default_init_weights: kaiming_normal_ (gain=sqrt(2), fan_in=C*3*3) * 0.1, bias=0
    fan_in = C * 3 * 3
    std = (2.0 / fan_in) ** 0.5
    w1 = jax.random.normal(kw1, (C, C, 3, 3), jnp.float32) * std * 0.1
    w2 = jax.random.normal(kw2, (C, C, 3, 3), jnp.float32) * std * 0.1
    b1 = jnp.zeros((C,), jnp.float32)
    b2 = jnp.zeros((C,), jnp.float32)

    # Hoisted prep (once per network) + lane-dense activations.
    params = prepare_resblock_params(w1, b1, w2, b2, W=W)
    x_packed = pack_nchw(x)

    run = jax.jit(functools.partial(residual_block_no_bn_packed,
                                    H=H, res_scale=res_scale))
    out_packed = jax.block_until_ready(run(x_packed, *params))
    out = unpack_nchw(out_packed, N, C, H, W)

    ref = _reference(x, w1, b1, w2, b2, res_scale)
    assert out.shape == (N, C, H, W)
    # bf16 MXU operands (f32 accumulate) vs pure-f32 reference; 0.1-scaled
    # weights keep the compounded error ~1e-4.
    err = float(jnp.max(jnp.abs(out - ref)))
    assert err < 2e-3, f"max |err| = {err}"

    print("KERNEL_OK")
</pallas_src>

<mosaic_0001>
module attributes {stable_mosaic.version = 11 : i64} {
  func.func @_resblock_kernel(%arg0: i32, %arg1: memref<32x128xf32, #tpu.memory_space<vmem>>, %arg2: memref<384x128xbf16, #tpu.memory_space<vmem>>, %arg3: memref<1x128xf32, #tpu.memory_space<vmem>>, %arg4: memref<384x128xbf16, #tpu.memory_space<vmem>>, %arg5: memref<1x128xf32, #tpu.memory_space<vmem>>, %arg6: memref<32x128xf32, #tpu.memory_space<vmem>>) attributes {dimension_semantics = [#tpu.dimension_semantics<parallel>], iteration_bounds = array<i64: 2>, scalar_prefetch = 0 : i64, scratch_operands = 0 : i64, tpu.core_type = #tpu.core_type<tc>, window_params = [{transform_indices = @transform_0, window_bounds = array<i64: 32, 128>}, {pipeline_mode = #tpu.pipeline_mode<synchronous>, transform_indices = @transform_1, window_bounds = array<i64: 384, 128>}, {pipeline_mode = #tpu.pipeline_mode<synchronous>, transform_indices = @transform_2, window_bounds = array<i64: 1, 128>}, {pipeline_mode = #tpu.pipeline_mode<synchronous>, transform_indices = @transform_3, window_bounds = array<i64: 384, 128>}, {pipeline_mode = #tpu.pipeline_mode<synchronous>, transform_indices = @transform_4, window_bounds = array<i64: 1, 128>}, {transform_indices = @transform_5, window_bounds = array<i64: 32, 128>}]} {
    %c0 = arith.constant 0 : index
    %c0_0 = arith.constant 0 : index
    %0 = vector.load %arg1[%c0, %c0_0] : memref<32x128xf32, #tpu.memory_space<vmem>>, vector<32x128xf32>
    %1 = tpu.iota {dimensions = array<i32: 0>} : vector<32x128xi32>
    %c16_i32 = arith.constant 16 : i32
    %c0_i32 = arith.constant 0 : i32
    %2 = arith.cmpi eq, %c16_i32, %c0_i32 : i32
    %c1_i32 = arith.constant 1 : i32
    %3 = arith.select %2, %c1_i32, %c16_i32 : i32
    %4 = vector.broadcast %3 : i32 to vector<32x128xi32>
    %5 = arith.remsi %1, %4 : vector<32x128xi32>
    %c0_i32_1 = arith.constant 0 : i32
    %6 = vector.broadcast %c0_i32_1 : i32 to vector<32x128xi32>
    %7 = arith.cmpi ne, %5, %6 : vector<32x128xi32>
    %c0_i32_2 = arith.constant 0 : i32
    %8 = vector.broadcast %c0_i32_2 : i32 to vector<32x128xi32>
    %9 = arith.cmpi slt, %5, %8 : vector<32x128xi32>
    %c0_i32_3 = arith.constant 0 : i32
    %10 = arith.cmpi slt, %3, %c0_i32_3 : i32
    %11 = vector.broadcast %10 : i1 to vector<32x128xi1>
    %12 = vector.broadcast %11 : vector<32x128xi1> to vector<32x128xi1>
    %13 = arith.xori %9, %12 : vector<32x128xi1>
    %14 = arith.andi %13, %7 : vector<32x128xi1>
    %15 = vector.broadcast %3 : i32 to vector<32x128xi32>
    %16 = arith.addi %5, %15 : vector<32x128xi32>
    %17 = arith.select %14, %16, %5 : vector<32x128xi1>, vector<32x128xi32>
    %c0_i32_4 = arith.constant 0 : i32
    %18 = vector.broadcast %c0_i32_4 : i32 to vector<32x128xi32>
    %19 = arith.cmpi eq, %17, %18 : vector<32x128xi32>
    %c16_i32_5 = arith.constant 16 : i32
    %c0_i32_6 = arith.constant 0 : i32
    %20 = arith.cmpi eq, %c16_i32_5, %c0_i32_6 : i32
    %c1_i32_7 = arith.constant 1 : i32
    %21 = arith.select %20, %c1_i32_7, %c16_i32_5 : i32
    %22 = vector.broadcast %21 : i32 to vector<32x128xi32>
    %23 = arith.remsi %1, %22 : vector<32x128xi32>
    %c0_i32_8 = arith.constant 0 : i32
    %24 = vector.broadcast %c0_i32_8 : i32 to vector<32x128xi32>
    %25 = arith.cmpi ne, %23, %24 : vector<32x128xi32>
    %c0_i32_9 = arith.constant 0 : i32
    %26 = vector.broadcast %c0_i32_9 : i32 to vector<32x128xi32>
    %27 = arith.cmpi slt, %23, %26 : vector<32x128xi32>
    %c0_i32_10 = arith.constant 0 : i32
    %28 = arith.cmpi slt, %21, %c0_i32_10 : i32
    %29 = vector.broadcast %28 : i1 to vector<32x128xi1>
    %30 = vector.broadcast %29 : vector<32x128xi1> to vector<32x128xi1>
    %31 = arith.xori %27, %30 : vector<32x128xi1>
    %32 = arith.andi %31, %25 : vector<32x128xi1>
    %33 = vector.broadcast %21 : i32 to vector<32x128xi32>
    %34 = arith.addi %23, %33 : vector<32x128xi32>
    %35 = arith.select %32, %34, %23 : vector<32x128xi1>, vector<32x128xi32>
    %c15_i32 = arith.constant 15 : i32
    %36 = vector.broadcast %c15_i32 : i32 to vector<32x128xi32>
    %37 = arith.cmpi eq, %35, %36 : vector<32x128xi32>
    %cst = arith.constant 0.000000e+00 : f32
    %38 = vector.broadcast %cst : f32 to vector<32x128xf32>
    %c1_i32_11 = arith.constant 1 : i32
    %39 = tpu.dynamic_rotate %0 by %c1_i32_11 dim 0 : vector<32x128xf32>, i32 -> vector<32x128xf32>
    %40 = arith.select %19, %38, %39 : vector<32x128xi1>, vector<32x128xf32>
    %c31_i32 = arith.constant 31 : i32
    %41 = tpu.dynamic_rotate %0 by %c31_i32 dim 0 : vector<32x128xf32>, i32 -> vector<32x128xf32>
    %42 = arith.select %37, %38, %41 : vector<32x128xi1>, vector<32x128xf32>
    %43 = arith.truncf %40 : vector<32x128xf32> to vector<32x128xbf16>
    %c0_12 = arith.constant 0 : index
    %c0_13 = arith.constant 0 : index
    %44 = vector.load %arg2[%c0_12, %c0_13] : memref<384x128xbf16, #tpu.memory_space<vmem>>, vector<128x128xbf16>
    %cst_14 = arith.constant dense<0.000000e+00> : vector<32x128xf32>
    %45 = tpu.matmul %43, %44, %cst_14 {dimension_numbers = #tpu.dot_dimension_numbers<[1], [0], [0], [1], [0, 0, 1, 1], [], []>} : vector<32x128xbf16>, vector<128x128xbf16>, vector<32x128xf32> -> vector<32x128xf32>
    %46 = arith.truncf %0 : vector<32x128xf32> to vector<32x128xbf16>
    %c128 = arith.constant 128 : index
    %c0_15 = arith.constant 0 : index
    %47 = vector.load %arg2[%c128, %c0_15] : memref<384x128xbf16, #tpu.memory_space<vmem>>, vector<128x128xbf16>
    %cst_16 = arith.constant dense<0.000000e+00> : vector<32x128xf32>
    %48 = tpu.matmul %46, %47, %cst_16 {dimension_numbers = #tpu.dot_dimension_numbers<[1], [0], [0], [1], [0, 0, 1, 1], [], []>} : vector<32x128xbf16>, vector<128x128xbf16>, vector<32x128xf32> -> vector<32x128xf32>
    %49 = arith.addf %45, %48 : vector<32x128xf32>
    %50 = arith.truncf %42 : vector<32x128xf32> to vector<32x128xbf16>
    %c256 = arith.constant 256 : index
    %c0_17 = arith.constant 0 : index
    %51 = vector.load %arg2[%c256, %c0_17] : memref<384x128xbf16, #tpu.memory_space<vmem>>, vector<128x128xbf16>
    %cst_18 = arith.constant dense<0.000000e+00> : vector<32x128xf32>
    %52 = tpu.matmul %50, %51, %cst_18 {dimension_numbers = #tpu.dot_dimension_numbers<[1], [0], [0], [1], [0, 0, 1, 1], [], []>} : vector<32x128xbf16>, vector<128x128xbf16>, vector<32x128xf32> -> vector<32x128xf32>
    %53 = arith.addf %49, %52 : vector<32x128xf32>
    %c0_19 = arith.constant 0 : index
    %c0_20 = arith.constant 0 : index
    %54 = vector.load %arg3[%c0_19, %c0_20] : memref<1x128xf32, #tpu.memory_space<vmem>>, vector<1x128xf32>
    %55 = vector.broadcast %54 : vector<1x128xf32> to vector<32x128xf32>
    %56 = arith.addf %53, %55 : vector<32x128xf32>
    %cst_21 = arith.constant 0.000000e+00 : f32
    %57 = vector.broadcast %cst_21 : f32 to vector<32x128xf32>
    %58 = arith.maximumf %56, %57 : vector<32x128xf32>
    %cst_22 = arith.constant 0.000000e+00 : f32
    %59 = vector.broadcast %cst_22 : f32 to vector<32x128xf32>
    %c1_i32_23 = arith.constant 1 : i32
    %60 = tpu.dynamic_rotate %58 by %c1_i32_23 dim 0 : vector<32x128xf32>, i32 -> vector<32x128xf32>
    %61 = arith.select %19, %59, %60 : vector<32x128xi1>, vector<32x128xf32>
    %c31_i32_24 = arith.constant 31 : i32
    %62 = tpu.dynamic_rotate %58 by %c31_i32_24 dim 0 : vector<32x128xf32>, i32 -> vector<32x128xf32>
    %63 = arith.select %37, %59, %62 : vector<32x128xi1>, vector<32x128xf32>
    %64 = arith.truncf %61 : vector<32x128xf32> to vector<32x128xbf16>
    %c0_25 = arith.constant 0 : index
    %c0_26 = arith.constant 0 : index
    %65 = vector.load %arg4[%c0_25, %c0_26] : memref<384x128xbf16, #tpu.memory_space<vmem>>, vector<128x128xbf16>
    %cst_27 = arith.constant dense<0.000000e+00> : vector<32x128xf32>
    %66 = tpu.matmul %64, %65, %cst_27 {dimension_numbers = #tpu.dot_dimension_numbers<[1], [0], [0], [1], [0, 0, 1, 1], [], []>} : vector<32x128xbf16>, vector<128x128xbf16>, vector<32x128xf32> -> vector<32x128xf32>
    %67 = arith.truncf %58 : vector<32x128xf32> to vector<32x128xbf16>
    %c128_28 = arith.constant 128 : index
    %c0_29 = arith.constant 0 : index
    %68 = vector.load %arg4[%c128_28, %c0_29] : memref<384x128xbf16, #tpu.memory_space<vmem>>, vector<128x128xbf16>
    %cst_30 = arith.constant dense<0.000000e+00> : vector<32x128xf32>
    %69 = tpu.matmul %67, %68, %cst_30 {dimension_numbers = #tpu.dot_dimension_numbers<[1], [0], [0], [1], [0, 0, 1, 1], [], []>} : vector<32x128xbf16>, vector<128x128xbf16>, vector<32x128xf32> -> vector<32x128xf32>
    %70 = arith.addf %66, %69 : vector<32x128xf32>
    %71 = arith.truncf %63 : vector<32x128xf32> to vector<32x128xbf16>
    %c256_31 = arith.constant 256 : index
    %c0_32 = arith.constant 0 : index
    %72 = vector.load %arg4[%c256_31, %c0_32] : memref<384x128xbf16, #tpu.memory_space<vmem>>, vector<128x128xbf16>
    %cst_33 = arith.constant dense<0.000000e+00> : vector<32x128xf32>
    %73 = tpu.matmul %71, %72, %cst_33 {dimension_numbers = #tpu.dot_dimension_numbers<[1], [0], [0], [1], [0, 0, 1, 1], [], []>} : vector<32x128xbf16>, vector<128x128xbf16>, vector<32x128xf32> -> vector<32x128xf32>
    %74 = arith.addf %70, %73 : vector<32x128xf32>
    %c0_34 = arith.constant 0 : index
    %c0_35 = arith.constant 0 : index
    %75 = vector.load %arg5[%c0_34, %c0_35] : memref<1x128xf32, #tpu.memory_space<vmem>>, vector<1x128xf32>
    %76 = vector.broadcast %75 : vector<1x128xf32> to vector<32x128xf32>
    %77 = arith.addf %74, %76 : vector<32x128xf32>
    %cst_36 = arith.constant 1.000000e+00 : f32
    %78 = vector.broadcast %cst_36 : f32 to vector<32x128xf32>
    %79 = arith.mulf %77, %78 : vector<32x128xf32>
    %80 = arith.addf %0, %79 : vector<32x128xf32>
    %c0_37 = arith.constant 0 : index
    %c0_38 = arith.constant 0 : index
    %81 = vector.load %arg6[%c0_37, %c0_38] : memref<32x128xf32, #tpu.memory_space<vmem>>, vector<32x128xf32>
    tpu.vector_store %arg6[%c0_37, %c0_38], %80 {strides = array<i32>} : memref<32x128xf32, #tpu.memory_space<vmem>>, vector<32x128xf32>,
    return
  }
  func.func @transform_0(%arg0: i32) -> (i32, i32) {
    %c0_i32 = arith.constant 0 : i32
    %c0_i32_0 = arith.constant 0 : i32
    return %arg0, %c0_i32 : i32, i32
  }
  func.func @transform_1(%arg0: i32) -> (i32, i32) {
    %c0_i32 = arith.constant 0 : i32
    %c0_i32_0 = arith.constant 0 : i32
    %c0_i32_1 = arith.constant 0 : i32
    return %c0_i32, %c0_i32_0 : i32, i32
  }
  func.func @transform_2(%arg0: i32) -> (i32, i32) {
    %c0_i32 = arith.constant 0 : i32
    %c0_i32_0 = arith.constant 0 : i32
    %c0_i32_1 = arith.constant 0 : i32
    return %c0_i32, %c0_i32_0 : i32, i32
  }
  func.func @transform_3(%arg0: i32) -> (i32, i32) {
    %c0_i32 = arith.constant 0 : i32
    %c0_i32_0 = arith.constant 0 : i32
    %c0_i32_1 = arith.constant 0 : i32
    return %c0_i32, %c0_i32_0 : i32, i32
  }
  func.func @transform_4(%arg0: i32) -> (i32, i32) {
    %c0_i32 = arith.constant 0 : i32
    %c0_i32_0 = arith.constant 0 : i32
    %c0_i32_1 = arith.constant 0 : i32
    return %c0_i32, %c0_i32_0 : i32, i32
  }
  func.func @transform_5(%arg0: i32) -> (i32, i32) {
    %c0_i32 = arith.constant 0 : i32
    %c0_i32_0 = arith.constant 0 : i32
    return %arg0, %c0_i32 : i32, i32
  }
}

</mosaic_0001>

<bundles_post_ra>
// kernel: residual_block_no_bn_packed.1
= control target key start
LH: loop header
LB: loop body
LE: loop exit
PB: predicated region body
PF: predicated region fallthrough
CT: control target
= control target key end

     0   :  { %10 = vsyncpa [#allocation3], 0  ;;  %s2212_s0 = inlined_call_operand.hbm [shape: f32[64,128], index: 0, kind: input, shape index: {}]   ;;  %s2213_s1 = inlined_call_operand.hbm [shape: bf16[384,128], index: 1, kind: input, shape index: {}]   ;;  %s2214_s2 = inlined_call_operand.vmem [shape: f32[1,128], index: 2, kind: input, shape index: {}]   ;;  %s2215_s3 = inlined_call_operand.hbm [shape: bf16[384,128], index: 3, kind: input, shape index: {}]   ;;  %s2216_s4 = inlined_call_operand.vmem [shape: f32[1,128], index: 4, kind: input, shape index: {}]   ;;  %s2217_s5 = inlined_call_operand.hbm [shape: f32[64,128], index: 5, kind: output, shape index: {}]  }
   0x1   :  { %12 = vsyncpa [#allocation3 + $0x1], 0 }
   0x2   :  { %13 = vsyncpa [#allocation6], 0 }
   0x3   :  { %14 = vsyncpa [#allocation4], 0 }
   0x4   :  { %16 = vsyncpa [#allocation4 + $0x1], 0  ;;  %s1851_s18 = smov 0   ;;  %s1853_s19 = smov 0  }
   0x5   :  { %s1855_s20 = smov 0   ;;  %s1857_s21 = smov 0  }
   0x6 LB: > { %s1872_s22 = sadd.s32 4294967295, %s1808_s21   ;;  %s1228_s23 = sadd.s32 4294967294, %s1808_s21   ;;  %s1808_s21 = sphi %s1857_s21, %s2245_s21   ;;  %s1804_s20 = sphi %s1855_s20, %s2244_s20   ;;  %s1800_s19 = sphi %s1853_s19, %s2243_s19   ;;  %s1796_s18 = sphi %s1851_s18, %s2242_s18  }
   0x7   : > { %p42_p0 = scmp.ne.s32.totalorder %s1800_s19, %s1796_s18  ;;  %p2218_p1 = scmp.eq.s32.totalorder %s1872_s22, 0 }
   0x8   : > { %p156_p3 = scmp.eq.s32.totalorder %s1228_s23, 1  ;;  %p1229_p5 = scmp.ge.s32.totalorder %s1808_s21, 1 }
   0x9   : > { %p1881_p4 = por %p2218_p1, %p42_p0  ;;  %p163_p7 = scmp.lt.s32.totalorder %s1808_s21, 3 }
   0xa   : > { %p1886_p6 = por %p156_p3, %p42_p0  ;;  %s1810_s27 = smov [#allocation5]  }
   0xb   : > { %s2221_s24 = scalar_select %p1881_p4, 1, 0 }
   0xc   : > { %s2222_s25 = scalar_select %p1886_p6, 1, 0 }
   0xd   : > { %p1891_p8 = pnand %p1229_p5, %p163_p7  ;;  %s175_s28 = sshll.u32 %s1810_s27, 4  ;;  %s1895_s28 = int_to_ptr.vmem [resolvable:$true] %s175_s28 }
   0xe   : > { %s1811_s30 = smov [#allocation7]   ;;  %s1652_s9 = scalar_lea.hbm %s2213_s1, 3072 }
   0xf   : > { %p1542_p9 = pneg %p1891_p8  ;;  %s191_s6 = sshll.u32 %s1811_s30, 4  ;;  %s1906_s6 = int_to_ptr.vmem [resolvable:$true] %s191_s6 }
  0x10   : > { %p1653_p12 = scmp.ne.s32.totalorder %s2213_s1, %s1652_s9  ;;  %p1659_p5 = scmp.lt.u32.totalorder %s1652_s9, %s2213_s1 }
  0x11   : > { %p1902_p11 = pnand %p1542_p9, %p2218_p1 }
  0x13   : > { %p1654_p13 = pneg %p1902_p11 }
  0x15   : > { %p1655_p0 = pnand %p1654_p13, %p1653_p12 }
  0x17   : > { %p1656_p3 = pneg %p1655_p0 }
  0x19   : > { %p1661_p7 = pnand %p1659_p5, %p1656_p3 }
  0x1b   : > { %1664 = shalt.err (!%p1661_p7)
}
  0x1c   : > { %s1665_s14 = scalar_lea.vmem %s1895_s28, 3072  ;;  %p1673_p2 = scmp.lt.s32.totalorder %s1895_s28, %s1895_s28 }
  0x1d   : > { %p1666_p9 = scmp.ne.s32.totalorder %s1895_s28, %s1665_s14  ;;  %p1674_p12 = scmp.lt.s32.totalorder %s1665_s14, %s1665_s14 }
  0x1f   : > { %p1668_p10 = pnand %p1666_p9, %p1654_p13  ;;  %p1675_p0 = por %p1674_p12, %p1673_p2 }
  0x21   : > { %p1669_p1 = pneg %p1668_p10 }
  0x23   : > { %p1676_p6 = pnand %p1675_p0, %p1669_p1 }
  0x25   : > { %1679 = shalt.err (!%p1676_p6)
}
  0x26   : > { %s1812_s15 = smov 64   ;;  %s1813_s16 = smov 4  }
  0x27   : > { %1545 = dma.hbm_to_vmem [thread:$0]  (!%p1902_p11), %s2213_s1, 3072, %s1895_s28, [#allocation6], %s1812_s15, %s1812_s15, %s1813_s16  }
  0x28   : > { %s1680_s7 = scalar_lea.hbm %s2215_s3, 3072 }
  0x29   : > { %p1681_p2 = scmp.ne.s32.totalorder %s2215_s3, %s1680_s7  ;;  %p1687_p10 = scmp.lt.u32.totalorder %s1680_s7, %s2215_s3 }
  0x2b   : > { %p1683_p1 = pnand %p1681_p2, %p1654_p13 }
  0x2d   : > { %p1684_p6 = pneg %p1683_p1 }
  0x2f   : > { %p1689_p3 = pnand %p1687_p10, %p1684_p6 }
  0x31   : > { %1692 = shalt.err (!%p1689_p3)
}
  0x32   : > { %s1693_s28 = scalar_lea.vmem %s1906_s6, 3072  ;;  %p1701_p12 = scmp.lt.s32.totalorder %s1906_s6, %s1906_s6 }
  0x33   : > { %p1694_p5 = scmp.ne.s32.totalorder %s1906_s6, %s1693_s28  ;;  %p1702_p0 = scmp.lt.s32.totalorder %s1693_s28, %s1693_s28 }
  0x35   : > { %p1696_p7 = pnand %p1694_p5, %p1654_p13  ;;  %p1703_p2 = por %p1702_p0, %p1701_p12 }
  0x37   : > { %p1697_p9 = pneg %p1696_p7 }
  0x39   : > { %p1704_p1 = pnand %p1703_p2, %p1697_p9 }
  0x3b   : > { %1707 = shalt.err (!%p1704_p1)
}
  0x3c   : > { %1548 = dma.hbm_to_vmem [thread:$0]  (!%p1902_p11), %s2215_s3, 3072, %s1906_s6, [#allocation6], %s1812_s15, %s1812_s15, %s1813_s16  }
  0x3d   : > { %s1961_s14 = sadd.s32 1, %s1808_s21   ;;  %s29_s29 = sadd.s32 1, %s1804_s20 }
  0x3e   : > { %s26_s17 = ssub.s32 %s1808_s21, %s1961_s14  ;;  %p36_p13 = scmp.ne.s32.totalorder %s1804_s20, %s1800_s19 }
  0x3f   : > { %p27_p6 = scmp.eq.s32.totalorder %s26_s17, 0  ;;  %p37_p10 = scmp.eq.s32.totalorder %s1808_s21, 0 }
  0x40   : > { %p2225_p3 = scmp.eq.s32.totalorder %s1872_s22, 1  ;;  %p1559_p7 = scmp.lt.s32.totalorder %s1808_s21, 2 }
  0x41   : > { %s1977_s27 = scalar_select %p27_p6, %s1804_s20, %s29_s29  }
  0x42   : > { %p1971_p5 = por %p2225_p3, %p36_p13  ;;  %p38_p9 = por %p37_p10, %p36_p13 }
  0x43   : > { %s208_s30 = sand.u32 1, %s1804_s20   ;;  %s1328_s6 = sshll.u32 %s1808_s21, 9 }
  0x44   : > { %s2226_s23 = scalar_select %p1971_p5, 1, 0 }
  0x45   : > { %s1233_s7 = sshll.u32 %s208_s30, 5  ;;  %s1984_s8 = scalar_lea.hbm %s2212_s0, %s1328_s6 }
  0x46   : > { %s212_s9 = scalar_lea.vmem [#allocation2], %s1233_s7  ;;  %p1988_p11 = pnand %p1559_p7, %p38_p9 }
  0x47   : > { %s219_s10 = sshll.u32 %s212_s9, 4  ;;  %s1992_s28 = scalar_lea.sflag [#allocation3], %s208_s30  ;;  %s1986_s10 = int_to_ptr.vmem [resolvable:$true] %s219_s10 }
  0x48   : > { %s1708_s12 = scalar_lea.hbm %s1984_s8, 512  ;;  %p1710_p0 = pneg %p1988_p11 }
  0x49   : > { %p1709_p12 = scmp.ne.s32.totalorder %s1984_s8, %s1708_s12  ;;  %s1713_s17 = scalar_lea.hbm %s2212_s0, 1024 }
  0x4a   : > { %p1714_p13 = scmp.lt.u32.totalorder %s1984_s8, %s2212_s0  ;;  %p1715_p6 = scmp.lt.u32.totalorder %s1713_s17, %s1708_s12 }
  0x4b   : > { %p1711_p2 = pnand %p1710_p0, %p1709_p12  ;;  %p1717_p3 = scmp.lt.u32.totalorder %s1708_s12, %s1984_s8 }
  0x4c   : > { %p1716_p10 = por %p1715_p6, %p1714_p13 }
  0x4d   : > { %p1712_p1 = pneg %p1711_p2 }
  0x4e   : > { %p1718_p7 = por %p1717_p3, %p1716_p10 }
  0x50   : > { %p1719_p9 = pnand %p1718_p7, %p1712_p1 }
  0x52   : > { %1722 = shalt.err (!%p1719_p9)
}
  0x53   : > { %s1723_s30 = scalar_lea.vmem %s1986_s10, 512  ;;  %s1814_s15 = smov [#allocation2]  }
  0x54   : > { %p1724_p12 = scmp.ne.s32.totalorder %s1986_s10, %s1723_s30  ;;  %s1728_s16 = sshll.u32 %s1814_s15, 4  ;;  %s1729_s16 = int_to_ptr.vmem [resolvable:$false] %s1728_s16 }
  0x55   : > { %s1730_s9 = scalar_lea.vmem %s1729_s16, 1024  ;;  %p1731_p4 = scmp.lt.s32.totalorder %s1986_s10, %s1729_s16 }
  0x56   : > { %p1726_p2 = pnand %p1724_p12, %p1710_p0  ;;  %p1732_p13 = scmp.lt.s32.totalorder %s1730_s9, %s1723_s30 }
  0x58   : > { %p1727_p5 = pneg %p1726_p2  ;;  %p1733_p6 = por %p1732_p13, %p1731_p4 }
  0x5a   : > { %p1734_p10 = pnand %p1733_p6, %p1727_p5 }
  0x5c   : > { %1737 = shalt.err (!%p1734_p10)
}
  0x5d   : > { %s1815_s12 = smov 128   ;;  %s1816_s13 = smov 8  }
  0x5e   : > { %1552 = dma.hbm_to_vmem [thread:$0]  (!%p1988_p11), %s1984_s8, 512, %s1986_s10, %s1992_s28, %s1815_s12, %s1815_s12, %s1816_s13  }
  0x5f   : > { %231 = sbr.rel (%p1891_p8) target bundleno = 723 (0x2d3), region = 40  ;;  %s2023_s29 = sand.u32 (!%p1891_p8), 1, %s1800_s19  }
  0x60   : > { %s1237_s17 = sshll.u32 (!%p1891_p8), %s2023_s29, 5  ;;  %s234_s7 = scalar_lea.sflag (!%p1891_p8), [#allocation3], %s2023_s29 }
  0x61   : > { %s2029_s6 = scalar_lea.vmem (!%p1891_p8), [#allocation2], %s1237_s17  ;;  %p2228_p4 = scmp.ne.s32.totalorder (!%p1891_p8), %s2221_s24, 0 }
  0x66   : > { %1783 = dma.done.wait (%p2228_p4), %s234_s7, 512  }
  0x67   : > { %1785 = vsyncadd (%p2228_p4), %s234_s7, 4294966784  ;;  %p2229_p5 = scmp.eq.s32.totalorder %s1872_s22, 0 }
  0x69   : > { %1787 = dma.done.wait (%p2229_p5), [#allocation6], 6144   ;;  %p2230_p8 = pmov %p2229_p5 }
  0x6a   : > { %v1604_v0 = vld [vmem:[#allocation5 + $0x40] sm:$0xff]   ;;  %v1605_v1 = vld [vmem:[#allocation5 + $0x48] sm:$0xff]   ;;  %v1606_v2 = vld [vmem:[#allocation5 + $0x50] sm:$0xff]   ;;  %v279_v8 = vlaneseq  ;;  %vm1817_vm2 = vmmov 1   ;;  %s271_s11 = scalar_lea.vmem [#allocation8], %s1237_s17  ;;  %s1329_s30 = sshll.u32 %s1872_s22, 9 }
  0x6b   : > { %1789 = vsyncadd (%p2230_p8), [#allocation6], 4294961152  ;;  %1394 = vmatprep.subr.bf16.mxu0 %v1604_v0  ;;  %v1607_v3 = vld [vmem:[#allocation5 + $0x58] sm:$0xff]   ;;  %v2040_v4 = vld [vmem:[%s2029_s6] sm:$0xff]  ;;  %s1136_s28 = sshll.u32 %s271_s11, 4  ;;  %s2167_s22 = scalar_lea.hbm %s2217_s5, %s1329_s30  ;;  %s2160_s28 = int_to_ptr.vmem [resolvable:$true] %s1136_s28 }
  0x6c   : > { %1395 = vmatpush3.bf16.msra.mxu0 %v1604_v0  ;;  %v2043_v5 = vld [vmem:[%s2029_s6 + $0x8] sm:$0xff]  ;;  %v1608_v7 = vld [vmem:[#allocation5 + $0x60] sm:$0xff]   ;;  %v2047_v10 = vshrl.u32 %v279_v8, 7  ;;  %v1610_v11 = vld [vmem:[#allocation5 + $0x70] sm:$0xff]   ;;  %v340_v14 = vrot.slane %v2040_v4, 7  ;;  %v353_v40 = vrot.slane %v2040_v4, 1 }
  0x6d   : > { %1396 = vmatprep.subr.bf16.mxu0 %v1605_v1  ;;  %v384_v6 = vpack.c.bf16 %v2043_v5, %v2040_v4  ;;  %v1609_v9 = vld [vmem:[#allocation5 + $0x68] sm:$0xff]   ;;  %v1611_v12 = vld [vmem:[#allocation5 + $0x78] sm:$0xff]   ;;  %v341_v16 = vrot.slane %v2043_v5, 7  ;;  %v1612_v18 = vld [vmem:[#allocation5] sm:$0xff]   ;;  %v354_v41 = vrot.slane %v2043_v5, 1  ;;  %s1123_s9 = scalar_lea.sflag [#allocation4], %s2023_s29 }
  0x6e   : > { %v288_v13 = vand.u32 15, %v2047_v10  ;;  %v2052_v15 = vld [vmem:[%s2029_s6 + $0x18] sm:$0xff]  ;;  %vm344_vm0 = vcmp.lt.s32.totalorder %v2047_v10, 1  ;;  %v2058_v19 = vld [vmem:[%s2029_s6 + $0x10] sm:$0xff]  ;;  %v1628_v22 = vld [vmem:[#allocation7 + $0x40] sm:$0xff]   ;;  %v282_v37 = vadd.s32 16, %v2047_v10 }
  0x6f   : > { %1410 = vmatprep.mubr.bf16.mxu0 %v384_v6  ;;  %v343_v17 = vrot.slane %v2052_v15, 7  ;;  %v347_v20 = vsel %vm344_vm0, %v340_v14, %v341_v16  ;;  %v1629_v23 = vld [vmem:[#allocation7 + $0x48] sm:$0xff]   ;;  %v385_v24 = vpack.c.bf16 %v2052_v15, %v2058_v19  ;;  %1454 = vmatprep.subr.bf16.mxu1 %v1628_v22  ;;  %v1630_v28 = vld [vmem:[#allocation7 + $0x50] sm:$0xff]   ;;  %v1631_v30 = vld [vmem:[#allocation7 + $0x58] sm:$0xff]   ;;  %v281_v38 = vadd.s32 8, %v2047_v10  ;;  %s1738_s12 = scalar_lea.vmem %s2160_s28, 512 }
  0x70   : > { %1397 = vmatpush3.bf16.msra.mxu0 %v1605_v1  ;;  %vm1330_vm1 = vcmp.ne.s32.totalorder %v288_v13, 0  ;;  %1455 = vmatpush3.bf16.msra.mxu1 %v1628_v22  ;;  %v1613_v27 = vld [vmem:[#allocation5 + $0x8] sm:$0xff]   ;;  %v1614_v29 = vld [vmem:[#allocation5 + $0x10] sm:$0xff]   ;;  %v1615_v31 = vld [vmem:[#allocation5 + $0x18] sm:$0xff]   ;;  %v342_v39 = vrot.slane %v2058_v19, 7  ;;  %v355_v42 = vrot.slane %v2058_v19, 1  ;;  %p1739_p11 = scmp.ne.s32.totalorder %s2160_s28, %s1738_s12 }
  0x71   : > { %1398 = vmatprep.subr.bf16.mxu0 %v1606_v2  ;;  %v348_v21 = vsel %vm344_vm0, %v343_v17, %v340_v14  ;;  %vm2071_vm3 = vmpackc.low %vm1817_vm2, %vm1330_vm1  ;;  %1456 = vmatprep.subr.bf16.mxu1 %v1629_v23  ;;  %v1632_v32 = vld [vmem:[#allocation7 + $0x60] sm:$0xff]   ;;  %v1633_v34 = vld [vmem:[#allocation7 + $0x68] sm:$0xff]   ;;  %v302_v44 = vand.u32 15, %v282_v37  ;;  %v295_v45 = vand.u32 15, %v281_v38  ;;  %vm357_vm4 = vcmp.lt.s32.totalorder %v2047_v10, 7  ;;  %p2239_p0 = scmp.ne.s32.totalorder %s2226_s23, 0 }
  0x72   : > { %v1259_v26 = vpack.c.bf16 %v347_v20, %v348_v21  ;;  %v1616_v33 = vld [vmem:[#allocation5 + $0x20] sm:$0xff]   ;;  %v1617_v35 = vld [vmem:[#allocation5 + $0x28] sm:$0xff]   ;;  %v1618_v36 = vld [vmem:[#allocation5 + $0x30] sm:$0xff]   ;;  %v345_v46 = vsel %vm344_vm0, %v342_v39, %v343_v17  ;;  %v346_v47 = vsel %vm344_vm0, %v341_v16, %v342_v39  ;;  %v359_v49 = vsel %vm357_vm4, %v354_v41, %v355_v42  ;;  %s1818_s13 = smov [#allocation8]  }
  0x73   : > { %v1619_v43 = vld [vmem:[#allocation5 + $0x38] sm:$0xff]   ;;  %v1620_v48 = vld [vmem:[#allocation5 + $0x80] sm:$0xff]   ;;  %vm1331_vm5 = vcmp.ne.s32.totalorder %v302_v44, 0  ;;  %v360_v50 = vsel %vm357_vm4, %v353_v40, %v354_v41  ;;  %vm1332_vm6 = vcmp.ne.s32.totalorder %v295_v45, 15  ;;  %v1263_v51 = vpack.c.bf16 %v345_v46, %v346_v47  ;;  %v1621_v54 = vld [vmem:[#allocation5 + $0x88] sm:$0xff]   ;;  %p1740_p1 = pnand %p1739_p11, %p2239_p0  ;;  %s1742_s17 = sshll.u32 %s1818_s13, 4  ;;  %s1743_s17 = int_to_ptr.vmem [resolvable:$false] %s1742_s17 }
  0x74   : > { %1399 = vmatpush3.bf16.msra.mxu0 %v1606_v2  ;;  %1457 = vmatpush3.bf16.msra.mxu1 %v1629_v23  ;;  %vm2097_vm7 = vmpackc.low %vm1817_vm2, %vm1331_vm5  ;;  %v1275_v53 = vpack.c.bf16 %v359_v49, %v360_v50  ;;  %v1622_v56 = vld [vmem:[#allocation5 + $0x90] sm:$0xff]   ;;  %v1623_v57 = vld [vmem:[#allocation5 + $0x98] sm:$0xff]   ;;  %v283_v61 = vadd.s32 24, %v2047_v10  ;;  %v356_v62 = vrot.slane %v2052_v15, 1  ;;  %s1744_s7 = scalar_lea.vmem %s1743_s17, 1024  ;;  %p1745_p7 = scmp.lt.s32.totalorder %s2160_s28, %s1743_s17 }
  0x75   : > { %1400 = vmatprep.subr.bf16.mxu0 %v1607_v3  ;;  %1458 = vmatprep.subr.bf16.mxu1 %v1630_v28  ;;  %vm2102_vm8 = vmpackc.low %vm1332_vm6, %vm1817_vm2  ;;  %v1624_v58 = vld [vmem:[#allocation5 + $0xa0] sm:$0xff]   ;;  %v1625_v59 = vld [vmem:[#allocation5 + $0xa8] sm:$0xff]   ;;  %p1741_p3 = pneg %p1740_p1  ;;  %p1746_p9 = scmp.lt.s32.totalorder %s1744_s7, %s1738_s12 }
  0x76   : > { %v1626_v60 = vld [vmem:[#allocation5 + $0xb0] sm:$0xff]   ;;  %v1627_v63 = vld [vmem:[#allocation5 + $0xb8] sm:$0xff]   ;;  %v309_v0 = vand.u32 15, %v283_v61  ;;  %v358_v1 = vsel %vm357_vm4, %v355_v42, %v356_v62  ;;  %v361_v2 = vsel %vm357_vm4, %v356_v62, %v353_v40  ;;  %v1637_v41 = vld [vmem:[#allocation7 + $0x8] sm:$0xff]  }
  0x77   : > { %v1635_v8 = vld [vmem:[#allocation7 + $0x78] sm:$0xff]   ;;  %v1638_v50 = vld [vmem:[#allocation7 + $0x10] sm:$0xff]   ;;  %v1644_v25 = vld [vmem:[#allocation7 + $0x80] sm:$0xff]   ;;  %p1747_p12 = por %p1746_p9, %p1745_p7 }
  0x78   : > { %1401 = vmatpush3.bf16.msra.mxu0 %v1607_v3  ;;  %1459 = vmatpush3.bf16.msra.mxu1 %v1630_v28  ;;  %vm1333_vm9 = vcmp.ne.s32.totalorder %v309_v0, 15  ;;  %v1279_v3 = vpack.c.bf16 %v361_v2, %v358_v1  ;;  %v1642_v10 = vld [vmem:[#allocation7 + $0x30] sm:$0xff]   ;;  %v1649_v61 = vld [vmem:[#allocation7 + $0xa8] sm:$0xff]   ;;  %v1651_v55 = vld [vmem:[#allocation7 + $0xb8] sm:$0xff]  }
  0x79   : > { %1402 = vmatprep.subr.bf16.mxu0 %v1608_v7  ;;  %1460 = vmatprep.subr.bf16.mxu1 %v1631_v30  ;;  %vm2117_vm10 = vmpackc.low %vm1333_vm9, %vm1817_vm2  ;;  %v1650_v52 = vld [vmem:[#allocation7 + $0xb0] sm:$0xff]   ;;  %v1322_v62 = vld [vmem:[%s2216_s4] ss:$0 sm:$0xff]  ;;  %p1748_p2 = pnand %p1747_p12, %p1741_p3 }
  0x7c   : > { %1403 = vmatpush3.bf16.msra.mxu0 %v1608_v7  ;;  %1461 = vmatpush3.bf16.msra.mxu1 %v1631_v30  ;;  %v1634_v7 = vld [vmem:[#allocation7 + $0x70] sm:$0xff]  }
  0x7d   : > { %1404 = vmatprep.subr.bf16.mxu0 %v1609_v9  ;;  %1462 = vmatprep.subr.bf16.mxu1 %v1632_v32 }
  0x80   : > { %1405 = vmatpush3.bf16.msra.mxu0 %v1609_v9  ;;  %1463 = vmatpush3.bf16.msra.mxu1 %v1632_v32  ;;  %v1636_v9 = vld [vmem:[#allocation7] sm:$0xff]  }
  0x81   : > { %1406 = vmatprep.subr.bf16.mxu0 %v1610_v11  ;;  %1464 = vmatprep.subr.bf16.mxu1 %v1633_v34 }
  0x84   : > { %1407 = vmatpush3.bf16.msra.mxu0 %v1610_v11  ;;  %1465 = vmatpush3.bf16.msra.mxu1 %v1633_v34  ;;  %v1281_v11 = vld [vmem:[%s2214_s2] ss:$0 sm:$0xff] }
  0x85   : > { %1408 = vmatprep.subr.bf16.mxu0 %v1611_v12  ;;  %1466 = vmatprep.subr.bf16.mxu1 %v1634_v7 }
  0x88   : > { %1409 = vmatpush3.bf16.msra.mxu0 %v1611_v12  ;;  %1467 = vmatpush3.bf16.msra.mxu1 %v1634_v7 }
  0x89   : > { %1414 = vmatprep.subr.bf16.mxu0 %v1612_v18  ;;  %1468 = vmatprep.subr.bf16.mxu1 %v1635_v8 }
  0x8b   : > { %1411 = vmatmul.mubr.bf16.vlgmr.msra.gmra.mrb[0].mxu0 %v385_v24 }
  0x8c   : > { %1415 = vmatpush3.bf16.msra.mxu0 %v1612_v18  ;;  %1430 = vmatprep.mubr.msk.bf16.mxu0 %vm2071_vm3, %v1259_v26 }
  0x8d   : > { %1416 = vmatprep.subr.bf16.mxu0 %v1613_v27  ;;  %1469 = vmatpush3.bf16.msra.mxu1 %v1635_v8 }
  0x8e   : > { %1474 = vmatprep.subr.bf16.mxu1 %v1636_v9 }
  0x90   : > { %1417 = vmatpush3.bf16.msra.mxu0 %v1613_v27 }
  0x91   : > { %1418 = vmatprep.subr.bf16.mxu0 %v1614_v29 }
  0x94   : > { %1419 = vmatpush3.bf16.msra.mxu0 %v1614_v29 }
  0x95   : > { %1420 = vmatprep.subr.bf16.mxu0 %v1615_v31 }
  0x98   : > { %1421 = vmatpush3.bf16.msra.mxu0 %v1615_v31 }
  0x99   : > { %1422 = vmatprep.subr.bf16.mxu0 %v1616_v33 }
  0x9c   : > { %1423 = vmatpush3.bf16.msra.mxu0 %v1616_v33 }
  0x9d   : > { %1424 = vmatprep.subr.bf16.mxu0 %v1617_v35 }
  0xa0   : > { %1425 = vmatpush3.bf16.msra.mxu0 %v1617_v35 }
  0xa1   : > { %1426 = vmatprep.subr.bf16.mxu0 %v1618_v36 }
  0xa4   : > { %1427 = vmatpush3.bf16.msra.mxu0 %v1618_v36 }
  0xa5   : > { %1428 = vmatprep.subr.bf16.mxu0 %v1619_v43 }
  0xa8   : > { %1429 = vmatpush3.bf16.msra.mxu0 %v1619_v43 }
  0xa9   : > { %1434 = vmatprep.subr.bf16.mxu0 %v1620_v48 }
  0xab   : > { %1431 = vmatmul.mubr.msk.bf16.vlgmr.msra.gmra.mrb[0].mxu0 %vm2097_vm7, %v1263_v51  ;;  %v1639_v51 = vld [vmem:[#allocation7 + $0x18] sm:$0xff]  }
  0xac   : > { %1435 = vmatpush3.bf16.msra.mxu0 %v1620_v48  ;;  %1450 = vmatprep.mubr.msk.bf16.mxu0 %vm2102_vm8, %v1275_v53  ;;  %v1640_v53 = vld [vmem:[#allocation7 + $0x20] sm:$0xff]  }
  0xad   : > { %1436 = vmatprep.subr.bf16.mxu0 %v1621_v54 }
  0xb0   : > { %1437 = vmatpush3.bf16.msra.mxu0 %v1621_v54  ;;  %v1641_v54 = vld [vmem:[#allocation7 + $0x28] sm:$0xff]  }
  0xb1   : > { %1438 = vmatprep.subr.bf16.mxu0 %v1622_v56 }
  0xb4   : > { %1439 = vmatpush3.bf16.msra.mxu0 %v1622_v56  ;;  %v1643_v56 = vld [vmem:[#allocation7 + $0x38] sm:$0xff]  }
  0xb5   : > { %1440 = vmatprep.subr.bf16.mxu0 %v1623_v57 }
  0xb8   : > { %1441 = vmatpush3.bf16.msra.mxu0 %v1623_v57  ;;  %v1645_v57 = vld [vmem:[#allocation7 + $0x88] sm:$0xff]  }
  0xb9   : > { %1442 = vmatprep.subr.bf16.mxu0 %v1624_v58 }
  0xbc   : > { %1443 = vmatpush3.bf16.msra.mxu0 %v1624_v58  ;;  %v1646_v58 = vld [vmem:[#allocation7 + $0x90] sm:$0xff]  }
  0xbd   : > { %1444 = vmatprep.subr.bf16.mxu0 %v1625_v59 }
  0xc0   : > { %1445 = vmatpush3.bf16.msra.mxu0 %v1625_v59  ;;  %v1647_v59 = vld [vmem:[#allocation7 + $0x98] sm:$0xff]  }
  0xc1   : > { %1446 = vmatprep.subr.bf16.mxu0 %v1626_v60 }
  0xc4   : > { %1447 = vmatpush3.bf16.msra.mxu0 %v1626_v60  ;;  %v1648_v60 = vld [vmem:[#allocation7 + $0xa0] sm:$0xff]  }
  0xc5   : > { %1448 = vmatprep.subr.bf16.mxu0 %v1627_v63 }
  0xc8   : > { %1449 = vmatpush3.bf16.msra.mxu0 %v1627_v63 }
  0xcb   : > { %1451 = vmatmul.mubr.msk.bf16.vlgmr.msra.gmra.mrb[0].mxu0 %vm2117_vm10, %v1279_v3 }
 0x19e   : > { %v1452_v12 = vpop.f32.mrb[0].mxu0 }
 0x19f   : > { %v724_v13 = vadd.f32 %v1452_v12, %v1281_v11  ;;  %v696_v14 = vpop.f32.mrb[1].mxu0 }
 0x1a0   : > { %v722_v16 = vadd.f32 %v1281_v11, %v696_v14  ;;  %v1453_v17 = vpop.f32.mrb[2].mxu0 }
 0x1a1   : > { %v728_v18 = vmax.f32 %v724_v13, 0.0  ;;  %v725_v20 = vadd.f32 %v1453_v17, %v1281_v11  ;;  %v699_v21 = vpop.f32.mrb[3].mxu0 }
 0x1a2   : > { %v726_v22 = vmax.f32 %v722_v16, 0.0  ;;  %v723_v23 = vadd.f32 %v1281_v11, %v699_v21 }
 0x1a3   : > { %v729_v24 = vmax.f32 %v725_v20, 0.0  ;;  %v732_v26 = vrot.slane %v728_v18, 7  ;;  %v744_v30 = vrot.slane %v728_v18, 1 }
 0x1a4   : > { %v730_v27 = vrot.slane %v726_v22, 7  ;;  %v742_v28 = vrot.slane %v726_v22, 1  ;;  %v727_v29 = vmax.f32 %v723_v23, 0.0 }
 0x1a5   : > { %v733_v31 = vrot.slane %v729_v24, 7  ;;  %v745_v32 = vrot.slane %v729_v24, 1  ;;  %v773_v33 = vpack.c.bf16 %v729_v24, %v728_v18 }
 0x1a6   : > { %v731_v34 = vrot.slane %v727_v29, 7  ;;  %v743_v35 = vrot.slane %v727_v29, 1  ;;  %v772_v36 = vpack.c.bf16 %v727_v29, %v726_v22 }
 0x1a7   : > { %v734_v37 = vsel %vm344_vm0, %v732_v26, %v733_v31  ;;  %v2130_v38 = vsel %vm357_vm4, %v744_v30, %v745_v32  ;;  %v749_v39 = vsel %vm357_vm4, %v745_v32, %v742_v28  ;;  %v737_v40 = vsel %vm344_vm0, %v733_v31, %v730_v27 }
 0x1a8   : > { %v1320_v42 = vpack.c.bf16 %v749_v39, %v2130_v38  ;;  %v735_v43 = vsel %vm344_vm0, %v731_v34, %v732_v26  ;;  %1470 = vmatprep.mubr.bf16.mxu1 %v772_v36  ;;  %v736_v44 = vsel %vm344_vm0, %v730_v27, %v731_v34  ;;  %v747_v45 = vsel %vm357_vm4, %v743_v35, %v744_v30 }
 0x1a9   : > { %v1304_v46 = vpack.c.bf16 %v734_v37, %v735_v43  ;;  %1471 = vmatmul.mubr.bf16.vlgmr.msra.gmra.mrb[0].mxu1 %v773_v33  ;;  %v1300_v47 = vpack.c.bf16 %v736_v44, %v737_v40  ;;  %v748_v48 = vsel %vm357_vm4, %v742_v28, %v743_v35 }
 0x1aa   : > { %1475 = vmatpush3.bf16.msra.mxu1 %v1636_v9  ;;  %v1316_v49 = vpack.c.bf16 %v747_v45, %v748_v48 }
 0x1ab   : > { %1490 = vmatprep.mubr.msk.bf16.mxu1 %vm2071_vm3, %v1300_v47  ;;  %1476 = vmatprep.subr.bf16.mxu1 %v1637_v41 }
 0x1ae   : > { %1477 = vmatpush3.bf16.msra.mxu1 %v1637_v41 }
 0x1af   : > { %1478 = vmatprep.subr.bf16.mxu1 %v1638_v50 }
 0x1b2   : > { %1479 = vmatpush3.bf16.msra.mxu1 %v1638_v50 }
 0x1b3   : > { %1480 = vmatprep.subr.bf16.mxu1 %v1639_v51 }
 0x1b6   : > { %1481 = vmatpush3.bf16.msra.mxu1 %v1639_v51 }
 0x1b7   : > { %1482 = vmatprep.subr.bf16.mxu1 %v1640_v53 }
 0x1ba   : > { %1483 = vmatpush3.bf16.msra.mxu1 %v1640_v53 }
 0x1bb   : > { %1484 = vmatprep.subr.bf16.mxu1 %v1641_v54 }
 0x1be   : > { %1485 = vmatpush3.bf16.msra.mxu1 %v1641_v54 }
 0x1bf   : > { %1486 = vmatprep.subr.bf16.mxu1 %v1642_v10 }
 0x1c2   : > { %1487 = vmatpush3.bf16.msra.mxu1 %v1642_v10 }
 0x1c3   : > { %1488 = vmatprep.subr.bf16.mxu1 %v1643_v56 }
 0x1c6   : > { %1489 = vmatpush3.bf16.msra.mxu1 %v1643_v56 }
 0x1c7   : > { %1494 = vmatprep.subr.bf16.mxu1 %v1644_v25 }
 0x1c9   : > { %1491 = vmatmul.mubr.msk.bf16.vlgmr.msra.gmra.mrb[0].mxu1 %vm2097_vm7, %v1304_v46 }
 0x1ca   : > { %1495 = vmatpush3.bf16.msra.mxu1 %v1644_v25  ;;  %1510 = vmatprep.mubr.msk.bf16.mxu1 %vm2102_vm8, %v1316_v49 }
 0x1cb   : > { %1496 = vmatprep.subr.bf16.mxu1 %v1645_v57 }
 0x1ce   : > { %1497 = vmatpush3.bf16.msra.mxu1 %v1645_v57 }
 0x1cf   : > { %1498 = vmatprep.subr.bf16.mxu1 %v1646_v58 }
 0x1d2   : > { %1499 = vmatpush3.bf16.msra.mxu1 %v1646_v58 }
 0x1d3   : > { %1500 = vmatprep.subr.bf16.mxu1 %v1647_v59 }
 0x1d6   : > { %1501 = vmatpush3.bf16.msra.mxu1 %v1647_v59 }
 0x1d7   : > { %1502 = vmatprep.subr.bf16.mxu1 %v1648_v60 }
 0x1da   : > { %1503 = vmatpush3.bf16.msra.mxu1 %v1648_v60 }
 0x1db   : > { %1504 = vmatprep.subr.bf16.mxu1 %v1649_v61 }
 0x1de   : > { %1505 = vmatpush3.bf16.msra.mxu1 %v1649_v61 }
 0x1df   : > { %1506 = vmatprep.subr.bf16.mxu1 %v1650_v52 }
 0x1e2   : > { %1507 = vmatpush3.bf16.msra.mxu1 %v1650_v52 }
 0x1e3   : > { %1508 = vmatprep.subr.bf16.mxu1 %v1651_v55 }
 0x1e6   : > { %1509 = vmatpush3.bf16.msra.mxu1 %v1651_v55 }
 0x1e9   : > { %1511 = vmatmul.mubr.msk.bf16.vlgmr.msra.gmra.mrb[0].mxu1 %vm2117_vm10, %v1320_v42 }
 0x2bc   : > { %v1512_v63 = vpop.f32.mrb[0].mxu1 }
 0x2bd   : > { %v1112_v0 = vadd.f32 %v1512_v63, %v1322_v62  ;;  %v1084_v1 = vpop.f32.mrb[1].mxu1 }
 0x2be   : > { %v1110_v2 = vadd.f32 %v1322_v62, %v1084_v1  ;;  %v1513_v3 = vpop.f32.mrb[2].mxu1 }
 0x2bf   : > { %v1116_v7 = vadd.f32 %v1112_v0, %v2058_v19  ;;  %v1113_v8 = vadd.f32 %v1513_v3, %v1322_v62  ;;  %v1087_v6 = vpop.f32.mrb[3].mxu1 }
 0x2c0   : > { %v1114_v9 = vadd.f32 %v1110_v2, %v2040_v4  ;;  %v1111_v11 = vadd.f32 %v1322_v62, %v1087_v6 }
 0x2c1   : > { %1120 = vst [vmem:[%s271_s11 + $0x10] sm:$0xff] %v1116_v7  ;;  %v1117_v12 = vadd.f32 %v1113_v8, %v2052_v15 }
 0x2c2   : > { %1118 = vst [vmem:[%s271_s11] sm:$0xff] %v1114_v9  ;;  %v1115_v19 = vadd.f32 %v1111_v11, %v2043_v5 }
 0x2c3   : > { %1121 = vst [vmem:[%s271_s11 + $0x18] sm:$0xff] %v1117_v12 }
 0x2c4   : > { %1119 = vst [vmem:[%s271_s11 + $0x8] sm:$0xff] %v1115_v19 }
 0x2c5   : > { %1751 = shalt.err (!%p1748_p2)
}
 0x2c6   : > { %s1752_s6 = scalar_lea.hbm %s2167_s22, 512  ;;  %s1756_s8 = scalar_lea.hbm %s2217_s5, 1024 }
 0x2c7   : > { %p1753_p13 = scmp.ne.s32.totalorder %s2167_s22, %s1752_s6  ;;  %p1757_p4 = scmp.lt.u32.totalorder %s2167_s22, %s2217_s5 }
 0x2c8   : > { %p1758_p5 = scmp.lt.u32.totalorder %s1756_s8, %s1752_s6  ;;  %p1760_p11 = scmp.lt.u32.totalorder %s1752_s6, %s2167_s22 }
 0x2c9   : > { %p1754_p6 = pnand %p1753_p13, %p2239_p0 }
 0x2ca   : > { %p1759_p8 = por %p1758_p5, %p1757_p4 }
 0x2cb   : > { %p1755_p10 = pneg %p1754_p6 }
 0x2cc   : > { %p1761_p1 = por %p1760_p11, %p1759_p8 }
 0x2ce   : > { %p1762_p3 = pnand %p1761_p1, %p1755_p10 }
 0x2d0   : > { %1765 = shalt.err (!%p1762_p3)
}
 0x2d1   : > { %s1819_s30 = smov 128   ;;  %s1820_s15 = smov 8  }
 0x2d2   : > { %1540 = dma.vmem_to_hbm [thread:$0]  (%p2239_p0), %s2160_s28, 512, %s2167_s22, %s1123_s9, %s1819_s30, %s1819_s30, %s1820_s15  }
 0x2d3 PF: > { %s1151_s16 = sand.u32 1, %s1796_s18   ;;  %p2240_p7 = scmp.ne.s32.totalorder %s2222_s25, 0 }
 0x2d4   : > { %p2241_p9 = scmp.ge.s32.totalorder %s1808_s21, 2  ;;  %s1152_s12 = scalar_lea.sflag [#allocation4], %s1151_s16 }
 0x2d6   : > { %p1554_p12 = pnand %p2241_p9, %p2240_p7 }
 0x2d8   : > { %1791 = dma.done.wait (!%p1554_p12), %s1152_s12, 512  }
 0x2d9   : > { %1793 = vsyncadd (!%p1554_p12), %s1152_s12, 4294966784  ;;  %p19_p2 = scmp.ge.s32.totalorder %s1961_s14, 4   ;;  %s2242_s18 = smov %s1800_s19 }
 0x2da   : > { %s2243_s19 = smov %s1804_s20  ;;  %s2244_s20 = smov %s1977_s27 }
 0x2db   : > { %s2245_s21 = smov %s1961_s14  ;;  %21 = sbr.rel (!%p19_p2) target bundleno = 6 (0x6), region = 93 }
 0x2e2   :  { %1157 = vsyncpa [#allocation3], 1 }
 0x2e3   :  { %1159 = vsyncpa [#allocation3 + $0x1], 1 }
 0x2e4   :  { %1160 = vsyncpa [#allocation6], 1 }
 0x2e5   :  { %1161 = vsyncpa [#allocation4], 1 }
 0x2e6   :  { %1163 = vsyncpa [#allocation4 + $0x1], 1 }

</bundles_post_ra>
